<compile_context>
chip_gen: v7x
topology: tpu7x:2x2x1
jax: 0.10.0
libtpu: 0.0.40
codegen_flags: <defaults>
</compile_context>

<pallas_src>
import jax
import jax.numpy as jnp
from jax.experimental import pallas as pl
from jax.experimental.pallas import tpu as pltpu


# ---------------------------------------------------------------------------
# Kernels
# ---------------------------------------------------------------------------
def _make_cam_kernel(matmul_dtype):
    """Single-block kernel: the whole (bb, C, N) slab is resident in VMEM."""

    def _cam_kernel(gamma_ref, x_ref, out_ref):
        x = x_ref[...]                                      # (bb, C, N)
        x_mm = x.astype(matmul_dtype)

        # energy[b] = x[b] @ x[b]^T (contract over spatial N) -> (bb, C, C) f32
        energy = jnp.einsum(
            "bcn,bdn->bcd", x_mm, x_mm, preferred_element_type=jnp.float32)

        # softmax(rowmax(e) - e) == exp(rowmin(e) - e) / sum(exp(rowmin(e) - e))
        m = jnp.min(energy, axis=-1, keepdims=True)         # (bb, C, 1)
        p = jnp.exp(m - energy)                             # (bb, C, C) f32
        denom = jnp.sum(p, axis=-1, keepdims=True)          # (bb, C, 1)
        attention = p * pl.reciprocal(denom, approx=True)   # EUP reciprocal

        out = jnp.einsum(
            "bcd,bdn->bcn", attention.astype(matmul_dtype), x_mm,
            preferred_element_type=jnp.float32)

        gamma = gamma_ref[0]                                # scalar from SMEM
        out_ref[...] = (gamma * out + x.astype(jnp.float32)).astype(out_ref.dtype)

    return _cam_kernel


def _make_cam_tiled_kernel(matmul_dtype, n_steps):
    """Two-pass N-tiled kernel.

    Grid axis 1 has 2*n_steps steps: steps [0, n_steps) accumulate the (C, C)
    Gram matrix over N tiles; step n_steps computes the softmax into scratch;
    steps [n_steps, 2*n_steps) stream x again and write out = attn @ x tile.
    """

    def _cam_kernel(gamma_ref, x_ref, out_ref, energy_acc, attn_scr):
        k = pl.program_id(1)

        @pl.when(k == 0)
        def _():
            energy_acc[...] = jnp.zeros_like(energy_acc)

        @pl.when(k < n_steps)                    # pass 1: accumulate Gram matrix
        def _():
            xt = x_ref[...].astype(matmul_dtype)
            energy_acc[...] += jnp.einsum(
                "bcn,bdn->bcd", xt, xt, preferred_element_type=jnp.float32)

        @pl.when(k == n_steps)                   # transition: softmax(rowmax - e)
        def _():
            e = energy_acc[...]
            m = jnp.min(e, axis=-1, keepdims=True)
            p = jnp.exp(m - e)
            denom = jnp.sum(p, axis=-1, keepdims=True)
            attn_scr[...] = (p * pl.reciprocal(denom, approx=True)).astype(
                matmul_dtype)

        @pl.when(k >= n_steps)                   # pass 2: out tile = attn @ x tile
        def _():
            x = x_ref[...]
            out = jnp.einsum(
                "bcd,bdn->bcn", attn_scr[...], x.astype(matmul_dtype),
                preferred_element_type=jnp.float32)
            gamma = gamma_ref[0]
            out_ref[...] = (gamma * out + x.astype(jnp.float32)).astype(out_ref.dtype)

    return _cam_kernel


# ---------------------------------------------------------------------------
# Block sizing
# ---------------------------------------------------------------------------
def _vmem_capacity_bytes():
    """Per-core VMEM capacity (128 MiB v5e/v6e, 64 MiB v7x); conservative fallback."""
    try:
        info = pltpu.get_tpu_info()
        for name in ("vmem_capacity_bytes", "vmem_size_bytes", "vmem_bytes"):
            cap = getattr(info, name, None)
            if cap:
                return int(cap)
    except Exception:
        pass
    return 64 * 1024 * 1024


def _choose_block_b(B, C, N, in_isz, out_isz, mm_isz, budget):
    """Batch elements per grid step for the single-block path (None = doesn't fit)."""
    per_b = (2 * C * N * in_isz          # double-buffered input blocks
             + 2 * C * N * out_isz       # double-buffered output blocks
             + 3 * C * N * 4             # f32 x upcast + f32 out einsum + slack
             + C * N * mm_isz            # matmul-dtype copy of x
             + 4 * C * C * 4)            # energy / p / attention intermediates
    if per_b > budget:
        return None
    bb = min(B, budget // per_b)
    # Megacore: >= 2 grid steps per TensorCore when B allows.
    if B >= 4:
        bb = min(bb, B // 4)
    elif B >= 2:
        bb = min(bb, B // 2)
    bb = max(bb, 1)
    # Even total step count so both TensorCores get equal work.
    while bb > 1 and pl.cdiv(B, bb) % 2 != 0:
        bb -= 1
    return bb


def _choose_n_tile(C, in_isz, out_isz, mm_isz, budget):
    """Spatial tile (multiple of 128) for the two-pass path with bb = 1."""
    per_col = C * (2 * in_isz + 2 * out_isz + 12 + mm_isz)
    fixed = 2 * C * C * 4 + C * C * mm_isz     # energy_acc + attn scratch
    avail = max(budget - fixed, 0)
    tn = (avail // max(per_col, 1)) // 128 * 128
    # TODO(synk): flash-style online softmax over the channel ('d') axis for C
    # large enough that the (C, C) scratch alone exceeds the VMEM budget.
    return max(int(tn), 128)


# ---------------------------------------------------------------------------
# pallas_call wrappers
# ---------------------------------------------------------------------------
def _cam_call_single(x_flat, gamma, bb, N_pad, matmul_dtype, out_dtype, vmem_limit):
    B, C, N = x_flat.shape
    if N_pad != N:
        x_flat = jnp.pad(x_flat, ((0, 0), (0, 0), (0, N_pad - N)))
    steps = pl.cdiv(B, bb)
    B_pad = steps * bb
    if B_pad != B:   # zero batch padding is exact; padded rows are sliced off
        x_flat = jnp.pad(x_flat, ((0, B_pad - B), (0, 0), (0, 0)))

    in_isz = jnp.dtype(x_flat.dtype).itemsize
    out_isz = jnp.dtype(out_dtype).itemsize
    cost = pl.CostEstimate(
        flops=4 * B_pad * C * C * N_pad,
        transcendentals=B_pad * C * C,
        bytes_accessed=B_pad * C * N_pad * (in_isz + out_isz))

    out_flat = pl.pallas_call(
        _make_cam_kernel(matmul_dtype),
        out_shape=jax.ShapeDtypeStruct((B_pad, C, N_pad), out_dtype),
        grid=(steps,),
        in_specs=[
            pl.BlockSpec(memory_space=pltpu.MemorySpace.SMEM),     # gamma scalar
            pl.BlockSpec((bb, C, N_pad), lambda b: (b, 0, 0)),
        ],
        out_specs=pl.BlockSpec((bb, C, N_pad), lambda b: (b, 0, 0)),
        compiler_params=pltpu.CompilerParams(
            dimension_semantics=("parallel",),
            vmem_limit_bytes=vmem_limit),
        cost_estimate=cost,
    )(gamma, x_flat)
    return out_flat[:B, :, :N]


def _cam_call_tiled(x_flat, gamma, bb, n_tile, matmul_dtype, out_dtype, vmem_limit):
    B, C, N = x_flat.shape
    N_pad = pl.cdiv(N, n_tile) * n_tile
    if N_pad != N:
        x_flat = jnp.pad(x_flat, ((0, 0), (0, 0), (0, N_pad - N)))
    steps_b = pl.cdiv(B, bb)
    B_pad = steps_b * bb
    if B_pad != B:
        x_flat = jnp.pad(x_flat, ((0, B_pad - B), (0, 0), (0, 0)))
    n_steps = N_pad // n_tile

    in_isz = jnp.dtype(x_flat.dtype).itemsize
    out_isz = jnp.dtype(out_dtype).itemsize
    cost = pl.CostEstimate(
        flops=4 * B_pad * C * C * N_pad,
        transcendentals=B_pad * C * C,
        bytes_accessed=B_pad * C * N_pad * (2 * in_isz + out_isz))  # x read twice

    out_flat = pl.pallas_call(
        _make_cam_tiled_kernel(matmul_dtype, n_steps),
        out_shape=jax.ShapeDtypeStruct((B_pad, C, N_pad), out_dtype),
        grid=(steps_b, 2 * n_steps),
        in_specs=[
            pl.BlockSpec(memory_space=pltpu.MemorySpace.SMEM),     # gamma scalar
            pl.BlockSpec(
                (bb, C, n_tile),
                lambda b, k: (b, 0, jnp.where(k < n_steps, k, k - n_steps))),
        ],
        # Output block stays parked on tile 0 during pass 1 (never flushed
        # because the index does not change), then streams tiles in pass 2.
        out_specs=pl.BlockSpec(
            (bb, C, n_tile),
            lambda b, k: (b, 0, jnp.maximum(k - n_steps, 0))),
        scratch_shapes=[
            pltpu.VMEM((bb, C, C), jnp.float32),      # energy accumulator
            pltpu.VMEM((bb, C, C), matmul_dtype),     # attention
        ],
        compiler_params=pltpu.CompilerParams(
            dimension_semantics=("parallel", "arbitrary"),
            vmem_limit_bytes=vmem_limit),
        cost_estimate=cost,
    )(gamma, x_flat)
    return out_flat[:B, :, :N]


# ---------------------------------------------------------------------------
# Public entry point
# ---------------------------------------------------------------------------
def cam_forward(x, gamma, *, matmul_dtype=jnp.bfloat16, out_dtype=None, n_tile=None):
    """CAM forward. x: (B, C, H, W); gamma: shape (1,). Returns (B, C, H, W).

    matmul_dtype: dtype fed to the MXU for both matmuls. bf16 (default) is the
      native MXU path on v5e/v6e/v7x; pass jnp.float32 for exact-f32 energy.
      Softmax / accumulation / epilogue stay f32 on all paths (required on v5e,
      whose VPU/EUP have no bf16).
    out_dtype: output dtype (defaults to x.dtype). bf16 x / out halves HBM
      traffic in the mem-bound small-C regime.
    n_tile: force the two-pass N-tiled path with this spatial tile (rounded up
      to a multiple of 128). Default: auto (single block when it fits VMEM).

    Note: C is not padded to the MXU width; non-multiple-of-128 C just
    under-fills MXU rows (padding C would require masking the padded energy
    columns before the row-min / exp).
    """
    B, C, H, W = x.shape
    N = H * W
    if out_dtype is None:
        out_dtype = x.dtype
    gamma = jnp.asarray(gamma, jnp.float32).reshape((1,))

    in_isz = jnp.dtype(x.dtype).itemsize
    out_isz = jnp.dtype(out_dtype).itemsize
    mm_isz = jnp.dtype(matmul_dtype).itemsize

    cap = _vmem_capacity_bytes()
    budget = cap // 2                    # working-set budget for block sizing
    vmem_limit = int(cap * 0.85)         # scoped VMEM limit (keep headroom)

    x_flat = x.reshape(B, C, N)

    if n_tile is None:
        N_pad = pl.cdiv(N, 128) * 128
        bb = _choose_block_b(B, C, N_pad, in_isz, out_isz, mm_isz, budget)
        if bb is not None:
            out_flat = _cam_call_single(
                x_flat, gamma, bb, N_pad, matmul_dtype, out_dtype, vmem_limit)
            return out_flat.reshape(B, C, H, W)
        n_tile = _choose_n_tile(C, in_isz, out_isz, mm_isz, budget)
    else:
        n_tile = pl.cdiv(int(n_tile), 128) * 128

    out_flat = _cam_call_tiled(
        x_flat, gamma, 1, n_tile, matmul_dtype, out_dtype, vmem_limit)
    return out_flat.reshape(B, C, H, W)


# ---------------------------------------------------------------------------
# Pure-JAX reference
# ---------------------------------------------------------------------------
def cam_reference(x, gamma, matmul_dtype=jnp.float32):
    """Mirrors the PyTorch forward; matmul_dtype lets us match the bf16-MXU path."""
    B, C, H, W = x.shape
    xf = x.reshape(B, C, H * W).astype(jnp.float32)
    xm = xf.astype(matmul_dtype)
    energy = jnp.einsum("bcn,bdn->bcd", xm, xm, preferred_element_type=jnp.float32)
    e_new = jnp.max(energy, axis=-1, keepdims=True) - energy
    attn = jax.nn.softmax(e_new, axis=-1)
    out = jnp.einsum("bcd,bdn->bcn", attn.astype(matmul_dtype), xm,
                     preferred_element_type=jnp.float32)
    out = out.reshape(B, C, H, W)
    return gamma[0] * out + xf.reshape(B, C, H, W)


if __name__ == "__main__":
    key = jax.random.PRNGKey(0)
    B, C, H, W = 2, 4, 16, 16
    x = jax.random.normal(key, (B, C, H, W), dtype=jnp.float32)

    gamma0 = jnp.zeros((1,), dtype=jnp.float32)      # nn.Parameter(torch.zeros(1))
    gamma_nz = jnp.array([0.5], dtype=jnp.float32)

    # 1. gamma = 0 (parameter init): output must equal x exactly (default bf16 MXU).
    out0 = cam_forward(x, gamma0)
    jax.block_until_ready(out0)
    assert jnp.allclose(out0, x, atol=1e-6, rtol=1e-6)

    # 2. Exact-semantics path (f32 matmuls) vs the f32 reference.
    out_f32 = cam_forward(x, gamma_nz, matmul_dtype=jnp.float32)
    jax.block_until_ready(out_f32)
    ref_f32 = cam_reference(x, gamma_nz)
    assert jnp.allclose(out_f32, ref_f32, atol=5e-3, rtol=5e-3)

    # 3. Default bf16-MXU path vs a matching bf16-matmul reference (softmax f32).
    out_bf16 = cam_forward(x, gamma_nz)
    jax.block_until_ready(out_bf16)
    ref_bf16 = cam_reference(x, gamma_nz, matmul_dtype=jnp.bfloat16)
    assert jnp.allclose(out_bf16, ref_bf16, atol=2e-2, rtol=2e-2)

    # 4. Two-pass N-tiled path (forced), f32 matmuls, vs the f32 reference.
    out_tiled = cam_forward(x, gamma_nz, matmul_dtype=jnp.float32, n_tile=128)
    jax.block_until_ready(out_tiled)
    assert jnp.allclose(out_tiled, ref_f32, atol=5e-3, rtol=5e-3)

    # 5. bf16 HBM I/O (mem-bound regime): gamma = 0 -> output equals x_bf16 exactly.
    x_bf16 = x.astype(jnp.bfloat16)
    out_io = cam_forward(x_bf16, gamma0)
    jax.block_until_ready(out_io)
    assert jnp.allclose(out_io.astype(jnp.float32), x_bf16.astype(jnp.float32),
                        atol=1e-6, rtol=1e-6)

    print("KERNEL_OK")
</pallas_src>

<mosaic_0001>
module attributes {stable_mosaic.version = 11 : i64} {
  func.func @_cam_kernel(%arg0: i32, %arg1: memref<1xf32, #tpu.memory_space<smem>>, %arg2: memref<1x4x256xf32, #tpu.memory_space<vmem>>, %arg3: memref<1x4x256xf32, #tpu.memory_space<vmem>>) attributes {dimension_semantics = [#tpu.dimension_semantics<parallel>], iteration_bounds = array<i64: 2>, scalar_prefetch = 0 : i64, scratch_operands = 0 : i64, tpu.core_type = #tpu.core_type<tc>, window_params = [{transform_indices = @transform_0, window_bounds = array<i64: 1>}, {transform_indices = @transform_1, window_bounds = array<i64: 1, 4, 256>}, {transform_indices = @transform_2, window_bounds = array<i64: 1, 4, 256>}]} {
    %c0 = arith.constant 0 : index
    %c0_0 = arith.constant 0 : index
    %c0_1 = arith.constant 0 : index
    %0 = vector.load %arg2[%c0, %c0_0, %c0_1] : memref<1x4x256xf32, #tpu.memory_space<vmem>>, vector<1x4x256xf32>
    %1 = arith.truncf %0 : vector<1x4x256xf32> to vector<1x4x256xbf16>
    "tpu.trace_start"() <{level = 10 : i32, message = "bcn,bdn->bcd"}> : () -> ()
    %cst = arith.constant dense<0.000000e+00> : vector<1x4x4xf32>
    %2 = tpu.matmul %1, %1, %cst {dimension_numbers = #tpu.dot_dimension_numbers<[2], [2], [1], [1], [0, 0, 0, 1, 1, 1], [0], [0]>} : vector<1x4x256xbf16>, vector<1x4x256xbf16>, vector<1x4x4xf32> -> vector<1x4x4xf32>
    "tpu.trace_stop"() : () -> ()
    %cst_2 = arith.constant dense<0x7F800000> : vector<1x4xf32>
    %3 = vector.multi_reduction <minimumf>, %2, %cst_2 [2] : vector<1x4x4xf32> to vector<1x4xf32>
    %4 = vector.shape_cast %3 : vector<1x4xf32> to vector<1x4x1xf32>
    %5 = vector.broadcast %4 : vector<1x4x1xf32> to vector<1x4x4xf32>
    %6 = arith.subf %5, %2 : vector<1x4x4xf32>
    %7 = math.exp %6 : vector<1x4x4xf32>
    %cst_3 = arith.constant dense<0.000000e+00> : vector<1x4xf32>
    %8 = vector.multi_reduction <add>, %7, %cst_3 [2] : vector<1x4x4xf32> to vector<1x4xf32>
    %9 = vector.shape_cast %8 : vector<1x4xf32> to vector<1x4x1xf32>
    %10 = tpu.reciprocal %9 {approx = true} : vector<1x4x1xf32> -> vector<1x4x1xf32>
    %11 = vector.broadcast %10 : vector<1x4x1xf32> to vector<1x4x4xf32>
    %12 = arith.mulf %7, %11 : vector<1x4x4xf32>
    %13 = arith.truncf %12 : vector<1x4x4xf32> to vector<1x4x4xbf16>
    "tpu.trace_start"() <{level = 10 : i32, message = "bcd,bdn->bcn"}> : () -> ()
    %cst_4 = arith.constant dense<0.000000e+00> : vector<1x4x256xf32>
    %14 = tpu.matmul %13, %1, %cst_4 {dimension_numbers = #tpu.dot_dimension_numbers<[2], [1], [1], [2], [0, 0, 0, 1, 1, 2], [0], [0]>} : vector<1x4x4xbf16>, vector<1x4x256xbf16>, vector<1x4x256xf32> -> vector<1x4x256xf32>
    "tpu.trace_stop"() : () -> ()
    %c0_5 = arith.constant 0 : index
    %15 = memref.load %arg1[%c0_5] : memref<1xf32, #tpu.memory_space<smem>>
    %16 = vector.broadcast %15 : f32 to vector<1x4x256xf32>
    %17 = arith.mulf %16, %14 : vector<1x4x256xf32>
    %18 = arith.addf %17, %0 : vector<1x4x256xf32>
    %c0_6 = arith.constant 0 : index
    %c0_7 = arith.constant 0 : index
    %c0_8 = arith.constant 0 : index
    %19 = vector.load %arg3[%c0_6, %c0_7, %c0_8] : memref<1x4x256xf32, #tpu.memory_space<vmem>>, vector<1x4x256xf32>
    tpu.vector_store %arg3[%c0_6, %c0_7, %c0_8], %18 {strides = array<i32>} : memref<1x4x256xf32, #tpu.memory_space<vmem>>, vector<1x4x256xf32>,
    return
  }
  func.func @transform_0(%arg0: i32) -> i32 {
    %c0_i32 = arith.constant 0 : i32
    %c0_i32_0 = arith.constant 0 : i32
    return %c0_i32 : i32
  }
  func.func @transform_1(%arg0: i32) -> (i32, i32, i32) {
    %c0_i32 = arith.constant 0 : i32
    %c0_i32_0 = arith.constant 0 : i32
    %c0_i32_1 = arith.constant 0 : i32
    return %arg0, %c0_i32, %c0_i32_0 : i32, i32, i32
  }
  func.func @transform_2(%arg0: i32) -> (i32, i32, i32) {
    %c0_i32 = arith.constant 0 : i32
    %c0_i32_0 = arith.constant 0 : i32
    %c0_i32_1 = arith.constant 0 : i32
    return %arg0, %c0_i32, %c0_i32_0 : i32, i32, i32
  }
}

</mosaic_0001>

<bundles_post_ra>
// kernel: tpu_custom_call.1
= control target key start
LH: loop header
LB: loop body
LE: loop exit
PB: predicated region body
PF: predicated region fallthrough
CT: control target
= control target key end

     0   :  { %s723_s0 = inlined_call_operand.<no memory space> [shape: f32[1], index: 0, kind: input, shape index: {}]   ;;  %s724_s1 = inlined_call_operand.hbm [shape: f32[2,4,256], index: 1, kind: input, shape index: {}]   ;;  %s725_s2 = inlined_call_operand.hbm [shape: f32[2,4,256], index: 2, kind: output, shape index: {}]  }
   0x1   :  { %7 = sst [smem:[#allocation2]] %s723_s0 }
   0x2   :  { %8 = vsyncpa [#allocation4], 0 }
   0x3   :  { %10 = vsyncpa [#allocation4 + $0x1], 0 }
   0x4   :  { %11 = vsyncpa [#allocation5], 0 }
   0x5   :  { %13 = vsyncpa [#allocation5 + $0x1], 0  ;;  %s558_s11 = smov 0   ;;  %s560_s12 = smov 0  }
   0x6   :  { %s562_s13 = smov 0   ;;  %s564_s14 = smov 0  }
   0x7 LB: > { %s579_s0 = sadd.s32 4294967295, %s535_s14   ;;  %s369_s15 = sadd.s32 4294967294, %s535_s14   ;;  %s535_s14 = sphi %s564_s14, %s740_s14   ;;  %s531_s13 = sphi %s562_s13, %s739_s13   ;;  %s527_s12 = sphi %s560_s12, %s738_s12   ;;  %s523_s11 = sphi %s558_s11, %s737_s11  }
   0x8   : > { %s583_s16 = sadd.s32 1, %s535_s14   ;;  %s47_s17 = sadd.s32 1, %s531_s13 }
   0x9   : > { %s44_s18 = ssub.s32 %s535_s14, %s583_s16  ;;  %p54_p0 = scmp.ne.s32.totalorder %s531_s13, %s527_s12 }
   0xa   : > { %p45_p1 = scmp.eq.s32.totalorder %s44_s18, 0  ;;  %p55_p2 = scmp.eq.s32.totalorder %s535_s14, 0 }
   0xb   : > { %p60_p3 = scmp.ne.s32.totalorder %s527_s12, %s523_s11  ;;  %p61_p4 = scmp.eq.s32.totalorder %s579_s0, 0 }
   0xc   : > { %s595_s19 = scalar_select %p45_p1, %s531_s13, %s47_s17  }
   0xd   : > { %p597_p5 = por %p55_p2, %p54_p0  ;;  %p601_p6 = por %p61_p4, %p60_p3 }
   0xe   : > { %p84_p7 = scmp.eq.s32.totalorder %s579_s0, 1  ;;  %p90_p8 = scmp.eq.s32.totalorder %s369_s15, 1 }
   0xf   : > { %p399_p10 = scmp.lt.s32.totalorder %s535_s14, 2  ;;  %s113_s24 = sand.u32 1, %s531_s13  }
  0x10   : > { %p608_p11 = por %p84_p7, %p54_p0  ;;  %p612_p12 = por %p90_p8, %p60_p3 }
  0x11   : > { %s385_s25 = sshll.u32 %s535_s14, 7  ;;  %s372_s26 = sshll.u32 %s113_s24, 3 }
  0x12   : > { %s729_s22 = scalar_select %p608_p11, 1, 0 }
  0x13   : > { %s730_s23 = scalar_select %p612_p12, 1, 0 }
  0x14   : > { %s621_s29 = scalar_lea.hbm %s724_s1, %s385_s25  ;;  %s117_s30 = scalar_lea.vmem [#allocation3], %s372_s26 }
  0x15   : > { %s125_s3 = sshll.u32 %s117_s30, 4  ;;  %p625_p13 = pnand %p399_p10, %p597_p5  ;;  %s629_s3 = int_to_ptr.vmem [resolvable:$true] %s125_s3 }
  0x16   : > { %s114_s5 = scalar_lea.sflag [#allocation4], %s113_s24  ;;  %s439_s6 = scalar_lea.hbm %s621_s29, 128 }
  0x17   : > { %p440_p2 = scmp.ne.s32.totalorder %s621_s29, %s439_s6  ;;  %p441_p3 = pneg %p625_p13 }
  0x18   : > { %s444_s9 = scalar_lea.hbm %s724_s1, 256  ;;  %p445_p5 = scmp.lt.u32.totalorder %s621_s29, %s724_s1 }
  0x19   : > { %p442_p4 = pnand %p441_p3, %p440_p2  ;;  %p446_p8 = scmp.lt.u32.totalorder %s444_s9, %s439_s6 }
  0x1a   : > { %p448_p9 = scmp.lt.u32.totalorder %s439_s6, %s621_s29 }
  0x1b   : > { %p443_p7 = pneg %p442_p4  ;;  %p447_p10 = por %p446_p8, %p445_p5 }
  0x1d   : > { %p449_p0 = por %p448_p9, %p447_p10 }
  0x1f   : > { %p450_p1 = pnand %p449_p0, %p443_p7 }
  0x21   : > { %453 = shalt.err (!%p450_p1)
}
  0x22   : > { %s454_s17 = scalar_lea.vmem %s629_s3, 128  ;;  %s537_s18 = smov [#allocation3]  }
  0x23   : > { %p455_p2 = scmp.ne.s32.totalorder %s629_s3, %s454_s17  ;;  %s459_s20 = sshll.u32 %s537_s18, 4  ;;  %s460_s20 = int_to_ptr.vmem [resolvable:$false] %s459_s20 }
  0x24   : > { %s461_s24 = scalar_lea.vmem %s460_s20, 256  ;;  %p462_p11 = scmp.lt.s32.totalorder %s629_s3, %s460_s20 }
  0x25   : > { %p457_p4 = pnand %p455_p2, %p441_p3  ;;  %p463_p5 = scmp.lt.s32.totalorder %s461_s24, %s454_s17 }
  0x27   : > { %p458_p12 = pneg %p457_p4  ;;  %p464_p8 = por %p463_p5, %p462_p11 }
  0x29   : > { %p465_p9 = pnand %p464_p8, %p458_p12 }
  0x2b   : > { %468 = shalt.err (!%p465_p9)
}
  0x2c   : > { %394 = dma.hbm_to_vmem [thread:$0]  (!%p625_p13), %s621_s29, 128, %s629_s3, %s114_s5  }
  0x2d   : > { %p732_p0 = scmp.lt.s32.totalorder %s535_s14, 3  ;;  %p733_p1 = scmp.ge.s32.totalorder %s535_s14, 1 }
  0x2f   : > { %p131_p3 = pnand %p733_p1, %p732_p0 }
  0x30   : > { %s663_s25 = sand.u32 (!%p131_p3), 1, %s527_s12  }
  0x31   : > { %134 = sbr.rel (%p131_p3) target bundleno = 831 (0x33f), region = 28  ;;  %s376_s26 = sshll.u32 (!%p131_p3), %s663_s25, 3 }
  0x32   : > { %s137_s27 = scalar_lea.sflag (!%p131_p3), [#allocation4], %s663_s25  ;;  %s140_s28 = scalar_lea.vmem (!%p131_p3), [#allocation3], %s376_s26 }
  0x38   : > { %514 = dma.done.wait (%p601_p6), %s137_s27, 128  }
  0x39   : > { %516 = vsyncadd (%p601_p6), %s137_s27, 4294967168  ;;  %v162_v0 = vld [vmem:[%s140_s28] sm:$0xff]  ;;  %vm208_vm0 = vcmask 27648   ;;  %vm225_vm1 = vcmask 1041408   ;;  %v538_v15 = vmov 0   ;;  %vm221_vm2 = vcmask 31744  }
  0x3a   : > { %v164_v1 = vcombine.high %v162_v0, %v162_v0  ;;  %v166_v2 = vpack.c.bf16 %v162_v0, %v162_v0  ;;  %264 = vmatprep.mubr.bf16.mxu1 %v538_v15  ;;  %s273_s21 = sld [smem:[#allocation2]]  ;;  %s386_s29 = sshll.u32 %s579_s0, 7 }
  0x3b   : > { %s160_s30 = scalar_lea.vmem [#allocation6], %s376_s26  ;;  %s679_s6 = scalar_lea.hbm %s725_s2, %s386_s29 }
  0x3c   : > { %v167_v3 = vpack.c.bf16 %v164_v1, %v164_v1  ;;  %v227_v14 = vsel %vm225_vm1, %v166_v2, 0  ;;  %s299_s3 = sshll.u32 %s160_s30, 4  ;;  %s285_s7 = scalar_lea.sflag [#allocation5], %s663_s25  ;;  %s681_s3 = int_to_ptr.vmem [resolvable:$true] %s299_s3 }
  0x3d   : > { %s469_s8 = scalar_lea.vmem %s681_s3, 128  ;;  %p734_p11 = scmp.ne.s32.totalorder %s729_s22, 0 }
  0x3e   : > { %168 = vmatprep.subr.bf16.mxu0 %v167_v3  ;;  %200 = vmatprep.mubr.bf16.mxu0 %v167_v3  ;;  %p470_p6 = scmp.ne.s32.totalorder %s681_s3, %s469_s8  ;;  %s539_s0 = smov [#allocation6]  }
  0x3f   : > { %169 = vmatpush1.bf16.xpose.msra.mxu0 %v166_v2  ;;  %378 = vmatprep.subr.msk.bf16.mxu1 %vm225_vm1, %v167_v3  ;;  %s473_s9 = sshll.u32 %s539_s0, 4  ;;  %s474_s9 = int_to_ptr.vmem [resolvable:$false] %s473_s9 }
  0x40   : > { %233 = vmatpush1.bf16.msra.mxu1 %v227_v14  ;;  %v274_v20 = vstv %s273_s21  ;;  %p471_p12 = pnand %p470_p6, %p734_p11  ;;  %s475_s10 = scalar_lea.vmem %s474_s9, 256 }
  0x41   : > { %p476_p7 = scmp.lt.s32.totalorder %s681_s3, %s474_s9  ;;  %p477_p10 = scmp.lt.s32.totalorder %s475_s10, %s469_s8 }
  0x42   : > { %p472_p13 = pneg %p471_p12 }
  0x43   : > { %p478_p2 = por %p477_p10, %p476_p7 }
  0x45   : > { %p479_p4 = pnand %p478_p2, %p472_p13 }
  0x46   : > { %201 = vmatmul.mubr.bf16.vlgmr.msra.gmra.mrb[0].mxu0 %v166_v2 }
 0x119   : > { %v202_v4 = vpop.f32.mrb[0].mxu0 }
 0x11a   : > { %v204_v5 = vpop.f32.mrb[1].mxu0  ;;  %v209_v6 = vsel %vm208_vm0, %v202_v4, inf }
 0x11b   : > { %210 = vmin.xlane.f32.xlu0 %v209_v6  ;;  %v205_v7 = vpop.f32.mrb[2].mxu0 }
 0x11c   : > { %v206_v8 = vpop.f32.mrb[3].mxu0 }
 0x1a8   : > { %v211_v9 = vpop.xlane.xlu0 %210 }
 0x1a9   : > { %v212_v10 = vsub.f32 %v211_v9, %v202_v4 }
 0x1ab   : > { %v213_v11 = vmul.f32 1.442695, %v212_v10 }
 0x1ad   : > { %435 = vpow2.f32 %v213_v11 }
 0x1b7   : > { %v436_v12 = vpop.eup %435 }
 0x1b8   : > { %v215_v13 = vsel %vm208_vm0, %v436_v12, 0.0 }
 0x1b9   : > { %216 = vadd.xlane.f32.xlu0 %v215_v13 }
 0x246   : > { %v217_v16 = vpop.xlane.xlu0 %216 }
 0x247   : > { %437 = vrcp.f32 %v217_v16 }
 0x251   : > { %v438_v17 = vpop.eup %437 }
 0x252   : > { %v219_v18 = vmul.f32 %v438_v17, %v436_v12 }
 0x254   : > { %v220_v19 = vpack.c.bf16 %v219_v18, %v219_v18 }
 0x256   : > { %379 = vmatmul.mubr.msk.bf16.vlgmr.msra.gmra.mrb[0].mxu1 %vm221_vm2, %v220_v19 }
 0x329   : > { %v266_v21 = vpop.f32.mrb[0].mxu1 }
 0x32a   : > { %v275_v22 = vmul.f32 %v274_v20, %v266_v21  ;;  %v268_v23 = vpop.f32.mrb[1].mxu1 }
 0x32b   : > { %v276_v24 = vmul.f32 %v274_v20, %v268_v23  ;;  %v270_v25 = vpop.f32.mrb[2].mxu1 }
 0x32c   : > { %v277_v26 = vadd.f32 %v275_v22, %v162_v0  ;;  %v271_v27 = vpop.f32.mrb[3].mxu1 }
 0x32d   : > { %v278_v28 = vadd.f32 %v276_v24, %v164_v1 }
 0x32f   : > { %v281_v29 = vcombine.low %v277_v26, %v278_v28 }
 0x331   : > { %283 = vst [vmem:[%s160_s30] sm:$0xff] %v281_v29 }
 0x332   : > { %482 = shalt.err (!%p479_p4)
}
 0x333   : > { %s483_s15 = scalar_lea.hbm %s679_s6, 128  ;;  %s487_s20 = scalar_lea.hbm %s725_s2, 256 }
 0x334   : > { %p484_p5 = scmp.ne.s32.totalorder %s679_s6, %s483_s15  ;;  %p488_p0 = scmp.lt.u32.totalorder %s679_s6, %s725_s2 }
 0x335   : > { %p489_p1 = scmp.lt.u32.totalorder %s487_s20, %s483_s15  ;;  %p491_p6 = scmp.lt.u32.totalorder %s483_s15, %s679_s6 }
 0x336   : > { %p485_p8 = pnand %p484_p5, %p734_p11 }
 0x337   : > { %p490_p3 = por %p489_p1, %p488_p0 }
 0x338   : > { %p486_p9 = pneg %p485_p8 }
 0x339   : > { %p492_p12 = por %p491_p6, %p490_p3 }
 0x33b   : > { %p493_p13 = pnand %p492_p12, %p486_p9 }
 0x33d   : > { %496 = shalt.err (!%p493_p13)
}
 0x33e   : > { %389 = dma.vmem_to_hbm [thread:$0]  (%p734_p11), %s681_s3, 128, %s679_s6, %s285_s7  }
 0x33f PF: > { %s311_s26 = sand.u32 1, %s523_s11   ;;  %p735_p7 = scmp.ne.s32.totalorder %s730_s23, 0 }
 0x340   : > { %p736_p10 = scmp.ge.s32.totalorder %s535_s14, 2  ;;  %s312_s27 = scalar_lea.sflag [#allocation5], %s311_s26 }
 0x342   : > { %p396_p2 = pnand %p736_p10, %p735_p7 }
 0x344   : > { %518 = dma.done.wait (!%p396_p2), %s312_s27, 128  }
 0x345   : > { %520 = vsyncadd (!%p396_p2), %s312_s27, 4294967168  ;;  %p16_p4 = scmp.ge.s32.totalorder %s583_s16, 4   ;;  %s737_s11 = smov %s527_s12 }
 0x346   : > { %s738_s12 = smov %s531_s13  ;;  %s739_s13 = smov %s595_s19 }
 0x347   : > { %s740_s14 = smov %s583_s16  ;;  %18 = sbr.rel (!%p16_p4) target bundleno = 7 (0x7), region = 73 }
 0x34e   :  { %317 = vsyncpa [#allocation4], 1 }
 0x34f   :  { %319 = vsyncpa [#allocation4 + $0x1], 1 }
 0x350   :  { %320 = vsyncpa [#allocation5], 1 }
 0x351   :  { %322 = vsyncpa [#allocation5 + $0x1], 1 }

</bundles_post_ra>
